<compile_context>
chip_gen: v6e
topology: v6e:2x2x1
jax: 0.10.0
libtpu: 0.0.40
codegen_flags: <defaults>
</compile_context>

<pallas_src>
import jax
import jax.numpy as jnp
from jax import lax
from jax.experimental import pallas as pl
from jax.experimental.pallas import tpu as pltpu


LAYERS = [9, 64, 32, 16, 2]   # matches the PyTorch module's `layers`
TILE_B = 2048                 # default batch tile (sweep 2048..4096 on v5e/v6e)


def _round_up(a, m):
    return -(-a // m) * m


def mlp_kernel(x_ref,
               w1_ref, b1_ref,
               w2_ref, b2_ref,
               w3_ref, b3_ref,
               w4t_ref, b4t_ref,
               out_ref):
    """4-layer MLP hot path: 3x (bf16 matmul + f32 bias + ReLU) + transposed final matmul."""
    x = x_ref[...].astype(jnp.bfloat16)                      # MXU-native input dtype

    h = jnp.dot(x, w1_ref[...], preferred_element_type=jnp.float32) + b1_ref[...]
    h = jnp.maximum(h, 0.0)        # Dropout(p=0.5) -> identity (eval), ReLU (f32 VPU)

    h = jnp.dot(h.astype(jnp.bfloat16), w2_ref[...],
                preferred_element_type=jnp.float32) + b2_ref[...]
    h = jnp.maximum(h, 0.0)        # Dropout(p=0.3) -> identity (eval), ReLU

    h = jnp.dot(h.astype(jnp.bfloat16), w3_ref[...],
                preferred_element_type=jnp.float32) + b3_ref[...]
    h = jnp.maximum(h, 0.0)        # Dropout(p=0.2) -> identity (eval), ReLU

    # Final layer computed transposed so the output block is lane-dense:
    #   out^T = W4^T @ h3^T  -> (2, tile_b); contract the 16-dim of both operands.
    out_t = lax.dot_general(
        w4t_ref[...], h.astype(jnp.bfloat16),
        dimension_numbers=(((1,), (1,)), ((), ())),
        preferred_element_type=jnp.float32) + b4t_ref[...]
    out_ref[...] = out_t.astype(out_ref.dtype)


def mlp_forward(x, params, *, tile_b=TILE_B):
    """x: (B, 9) float32 or bfloat16. params: list of (W, b) with W (in, out), b (1, out)."""
    B, in_size = x.shape
    assert in_size == LAYERS[0]
    out_size = LAYERS[-1]

    # --- batch tiling -------------------------------------------------------
    # Tiny batches: one un-padded (mult-of-8) tile.  Larger batches: tiles that
    # are multiples of 128 (legal lane-dense out block) and at least 2 grid
    # steps so the "parallel" axis can split across both v7x TensorCores.
    b8 = _round_up(max(B, 8), 8)
    if b8 <= 256:
        tile_b_eff = b8
    else:
        tile_b_eff = min(tile_b, _round_up(-(-b8 // 2), 128))
    pad_B = _round_up(b8, tile_b_eff)
    if pad_B != B:
        x = jnp.pad(x, ((0, pad_B - B), (0, 0)))
    grid = (pad_B // tile_b_eff,)

    # --- params: bf16 weights, f32 biases; last layer pre-transposed --------
    flat = []
    n_layers = len(params)
    for li, (w, b) in enumerate(params):
        if li < n_layers - 1:
            flat.append(w.astype(jnp.bfloat16))                    # (in, out)
            flat.append(b.reshape(1, -1).astype(jnp.float32))      # (1, out)
        else:
            flat.append(w.astype(jnp.bfloat16).T)                  # (out, in) = (2, 16)
            flat.append(b.reshape(-1, 1).astype(jnp.float32))      # (2, 1)

    def resident_spec(arr):
        # Constant block index -> fetched once, stays resident across grid steps.
        return pl.BlockSpec(arr.shape, lambda i: (0, 0))

    in_specs = [pl.BlockSpec((tile_b_eff, in_size), lambda i: (i, 0))]
    in_specs += [resident_spec(a) for a in flat]
    out_specs = pl.BlockSpec((out_size, tile_b_eff), lambda i: (0, i))

    param_bytes = sum(int(a.size) * a.dtype.itemsize for a in flat)
    flops = 2 * pad_B * sum(LAYERS[i] * LAYERS[i + 1] for i in range(len(LAYERS) - 1))
    bytes_accessed = (pad_B * (in_size * x.dtype.itemsize + out_size * 4)
                      + param_bytes)
    cost = pl.CostEstimate(flops=flops, transcendentals=0,
                           bytes_accessed=bytes_accessed)

    out_t = pl.pallas_call(
        mlp_kernel,
        out_shape=jax.ShapeDtypeStruct((out_size, pad_B), jnp.float32),
        grid_spec=pltpu.PrefetchScalarGridSpec(
            num_scalar_prefetch=0,
            grid=grid,
            in_specs=in_specs,
            out_specs=out_specs,
        ),
        compiler_params=pltpu.CompilerParams(
            dimension_semantics=("parallel",)),
        cost_estimate=cost,
    )(x, *flat)

    return out_t[:, :B].T


def init_params(key):
    """Deterministic init mimicking nn.Linear default: U(-1/sqrt(fan_in), +1/sqrt(fan_in))."""
    params = []
    for idx in range(len(LAYERS) - 1):
        fan_in, fan_out = LAYERS[idx], LAYERS[idx + 1]
        key, kw, kb = jax.random.split(key, 3)
        bound = 1.0 / jnp.sqrt(float(fan_in))
        w = jax.random.uniform(kw, (fan_in, fan_out), jnp.float32, -bound, bound)
        b = jax.random.uniform(kb, (1, fan_out), jnp.float32, -bound, bound)
        params.append((w, b))
    return params


def mlp_reference(x, params):
    """Pure-JAX reference matching the kernel's quantization (bf16 matmul inputs, f32 accum)."""
    h = x
    for i, (w, b) in enumerate(params):
        h = jnp.dot(h.astype(jnp.bfloat16), w.astype(jnp.bfloat16),
                    preferred_element_type=jnp.float32) + b
        if i < len(params) - 1:
            h = jnp.maximum(h, 0.0)
    return h


if __name__ == "__main__":
    key = jax.random.PRNGKey(0)
    k_x, k_p, k_x2 = jax.random.split(key, 3)

    params = init_params(k_p)

    # Small demo batch: single tile, grid = 1.
    B = 32
    x = jax.random.normal(k_x, (B, LAYERS[0]), dtype=jnp.float32)
    out = jax.block_until_ready(mlp_forward(x, params))
    ref = mlp_reference(x, params)
    assert out.shape == (B, LAYERS[-1])
    assert jnp.allclose(out, ref, atol=2e-3, rtol=2e-3), "mismatch vs reference (B=32)"

    # Multi-tile path: padding + grid >= 2 + lane-dense (2, tile_b) output blocks.
    B2 = 300
    x2 = jax.random.normal(k_x2, (B2, LAYERS[0]), dtype=jnp.float32)
    out2 = jax.block_until_ready(mlp_forward(x2, params))
    ref2 = mlp_reference(x2, params)
    assert out2.shape == (B2, LAYERS[-1])
    assert jnp.allclose(out2, ref2, atol=2e-3, rtol=2e-3), "mismatch vs reference (B=300)"

    print("KERNEL_OK")
</pallas_src>

<mosaic_0001>
module attributes {stable_mosaic.version = 11 : i64} {
  func.func @mlp_kernel(%arg0: i32, %arg1: memref<32x9xf32, #tpu.memory_space<vmem>>, %arg2: memref<9x64xbf16, #tpu.memory_space<vmem>>, %arg3: memref<1x64xf32, #tpu.memory_space<vmem>>, %arg4: memref<64x32xbf16, #tpu.memory_space<vmem>>, %arg5: memref<1x32xf32, #tpu.memory_space<vmem>>, %arg6: memref<32x16xbf16, #tpu.memory_space<vmem>>, %arg7: memref<1x16xf32, #tpu.memory_space<vmem>>, %arg8: memref<2x16xbf16, #tpu.memory_space<vmem>>, %arg9: memref<2x1xf32, #tpu.memory_space<vmem>>, %arg10: memref<2x32xf32, #tpu.memory_space<vmem>>) attributes {dimension_semantics = [#tpu.dimension_semantics<parallel>], iteration_bounds = array<i64: 1>, scalar_prefetch = 0 : i64, scratch_operands = 0 : i64, tpu.core_type = #tpu.core_type<tc>, window_params = [{transform_indices = @transform_0, window_bounds = array<i64: 32, 9>}, {pipeline_mode = #tpu.pipeline_mode<synchronous>, transform_indices = @transform_1, window_bounds = array<i64: 9, 64>}, {pipeline_mode = #tpu.pipeline_mode<synchronous>, transform_indices = @transform_2, window_bounds = array<i64: 1, 64>}, {pipeline_mode = #tpu.pipeline_mode<synchronous>, transform_indices = @transform_3, window_bounds = array<i64: 64, 32>}, {pipeline_mode = #tpu.pipeline_mode<synchronous>, transform_indices = @transform_4, window_bounds = array<i64: 1, 32>}, {pipeline_mode = #tpu.pipeline_mode<synchronous>, transform_indices = @transform_5, window_bounds = array<i64: 32, 16>}, {pipeline_mode = #tpu.pipeline_mode<synchronous>, transform_indices = @transform_6, window_bounds = array<i64: 1, 16>}, {pipeline_mode = #tpu.pipeline_mode<synchronous>, transform_indices = @transform_7, window_bounds = array<i64: 2, 16>}, {pipeline_mode = #tpu.pipeline_mode<synchronous>, transform_indices = @transform_8, window_bounds = array<i64: 2, 1>}, {transform_indices = @transform_9, window_bounds = array<i64: 2, 32>}]} {
    %c0 = arith.constant 0 : index
    %c0_0 = arith.constant 0 : index
    %0 = vector.load %arg1[%c0, %c0_0] : memref<32x9xf32, #tpu.memory_space<vmem>>, vector<32x9xf32>
    %1 = arith.truncf %0 : vector<32x9xf32> to vector<32x9xbf16>
    %c0_1 = arith.constant 0 : index
    %c0_2 = arith.constant 0 : index
    %2 = vector.load %arg2[%c0_1, %c0_2] : memref<9x64xbf16, #tpu.memory_space<vmem>>, vector<9x64xbf16>
    %cst = arith.constant dense<0.000000e+00> : vector<32x64xf32>
    %3 = tpu.matmul %1, %2, %cst {dimension_numbers = #tpu.dot_dimension_numbers<[1], [0], [0], [1], [0, 0, 1, 1], [], []>} : vector<32x9xbf16>, vector<9x64xbf16>, vector<32x64xf32> -> vector<32x64xf32>
    %c0_3 = arith.constant 0 : index
    %c0_4 = arith.constant 0 : index
    %4 = vector.load %arg3[%c0_3, %c0_4] : memref<1x64xf32, #tpu.memory_space<vmem>>, vector<1x64xf32>
    %5 = vector.broadcast %4 : vector<1x64xf32> to vector<32x64xf32>
    %6 = arith.addf %3, %5 : vector<32x64xf32>
    %cst_5 = arith.constant 0.000000e+00 : f32
    %7 = vector.broadcast %cst_5 : f32 to vector<32x64xf32>
    %8 = arith.maximumf %6, %7 : vector<32x64xf32>
    %9 = arith.truncf %8 : vector<32x64xf32> to vector<32x64xbf16>
    %c0_6 = arith.constant 0 : index
    %c0_7 = arith.constant 0 : index
    %10 = vector.load %arg4[%c0_6, %c0_7] : memref<64x32xbf16, #tpu.memory_space<vmem>>, vector<64x32xbf16>
    %cst_8 = arith.constant dense<0.000000e+00> : vector<32x32xf32>
    %11 = tpu.matmul %9, %10, %cst_8 {dimension_numbers = #tpu.dot_dimension_numbers<[1], [0], [0], [1], [0, 0, 1, 1], [], []>} : vector<32x64xbf16>, vector<64x32xbf16>, vector<32x32xf32> -> vector<32x32xf32>
    %c0_9 = arith.constant 0 : index
    %c0_10 = arith.constant 0 : index
    %12 = vector.load %arg5[%c0_9, %c0_10] : memref<1x32xf32, #tpu.memory_space<vmem>>, vector<1x32xf32>
    %13 = vector.broadcast %12 : vector<1x32xf32> to vector<32x32xf32>
    %14 = arith.addf %11, %13 : vector<32x32xf32>
    %cst_11 = arith.constant 0.000000e+00 : f32
    %15 = vector.broadcast %cst_11 : f32 to vector<32x32xf32>
    %16 = arith.maximumf %14, %15 : vector<32x32xf32>
    %17 = arith.truncf %16 : vector<32x32xf32> to vector<32x32xbf16>
    %c0_12 = arith.constant 0 : index
    %c0_13 = arith.constant 0 : index
    %18 = vector.load %arg6[%c0_12, %c0_13] : memref<32x16xbf16, #tpu.memory_space<vmem>>, vector<32x16xbf16>
    %cst_14 = arith.constant dense<0.000000e+00> : vector<32x16xf32>
    %19 = tpu.matmul %17, %18, %cst_14 {dimension_numbers = #tpu.dot_dimension_numbers<[1], [0], [0], [1], [0, 0, 1, 1], [], []>} : vector<32x32xbf16>, vector<32x16xbf16>, vector<32x16xf32> -> vector<32x16xf32>
    %c0_15 = arith.constant 0 : index
    %c0_16 = arith.constant 0 : index
    %20 = vector.load %arg7[%c0_15, %c0_16] : memref<1x16xf32, #tpu.memory_space<vmem>>, vector<1x16xf32>
    %21 = vector.broadcast %20 : vector<1x16xf32> to vector<32x16xf32>
    %22 = arith.addf %19, %21 : vector<32x16xf32>
    %cst_17 = arith.constant 0.000000e+00 : f32
    %23 = vector.broadcast %cst_17 : f32 to vector<32x16xf32>
    %24 = arith.maximumf %22, %23 : vector<32x16xf32>
    %c0_18 = arith.constant 0 : index
    %c0_19 = arith.constant 0 : index
    %25 = vector.load %arg8[%c0_18, %c0_19] : memref<2x16xbf16, #tpu.memory_space<vmem>>, vector<2x16xbf16>
    %26 = arith.truncf %24 : vector<32x16xf32> to vector<32x16xbf16>
    %cst_20 = arith.constant dense<0.000000e+00> : vector<2x32xf32>
    %27 = tpu.matmul %25, %26, %cst_20 {dimension_numbers = #tpu.dot_dimension_numbers<[1], [1], [0], [0], [0, 0, 1, 0], [], []>} : vector<2x16xbf16>, vector<32x16xbf16>, vector<2x32xf32> -> vector<2x32xf32>
    %c0_21 = arith.constant 0 : index
    %c0_22 = arith.constant 0 : index
    %28 = vector.load %arg9[%c0_21, %c0_22] : memref<2x1xf32, #tpu.memory_space<vmem>>, vector<2x1xf32>
    %29 = vector.broadcast %28 : vector<2x1xf32> to vector<2x32xf32>
    %30 = arith.addf %27, %29 : vector<2x32xf32>
    %c0_23 = arith.constant 0 : index
    %c0_24 = arith.constant 0 : index
    %31 = vector.load %arg10[%c0_23, %c0_24] : memref<2x32xf32, #tpu.memory_space<vmem>>, vector<2x32xf32>
    tpu.vector_store %arg10[%c0_23, %c0_24], %30 {strides = array<i32>} : memref<2x32xf32, #tpu.memory_space<vmem>>, vector<2x32xf32>,
    return
  }
  func.func @transform_0(%arg0: i32) -> (i32, i32) {
    %c0_i32 = arith.constant 0 : i32
    %c0_i32_0 = arith.constant 0 : i32
    return %arg0, %c0_i32 : i32, i32
  }
  func.func @transform_1(%arg0: i32) -> (i32, i32) {
    %c0_i32 = arith.constant 0 : i32
    %c0_i32_0 = arith.constant 0 : i32
    %c0_i32_1 = arith.constant 0 : i32
    return %c0_i32, %c0_i32_0 : i32, i32
  }
  func.func @transform_2(%arg0: i32) -> (i32, i32) {
    %c0_i32 = arith.constant 0 : i32
    %c0_i32_0 = arith.constant 0 : i32
    %c0_i32_1 = arith.constant 0 : i32
    return %c0_i32, %c0_i32_0 : i32, i32
  }
  func.func @transform_3(%arg0: i32) -> (i32, i32) {
    %c0_i32 = arith.constant 0 : i32
    %c0_i32_0 = arith.constant 0 : i32
    %c0_i32_1 = arith.constant 0 : i32
    return %c0_i32, %c0_i32_0 : i32, i32
  }
  func.func @transform_4(%arg0: i32) -> (i32, i32) {
    %c0_i32 = arith.constant 0 : i32
    %c0_i32_0 = arith.constant 0 : i32
    %c0_i32_1 = arith.constant 0 : i32
    return %c0_i32, %c0_i32_0 : i32, i32
  }
  func.func @transform_5(%arg0: i32) -> (i32, i32) {
    %c0_i32 = arith.constant 0 : i32
    %c0_i32_0 = arith.constant 0 : i32
    %c0_i32_1 = arith.constant 0 : i32
    return %c0_i32, %c0_i32_0 : i32, i32
  }
  func.func @transform_6(%arg0: i32) -> (i32, i32) {
    %c0_i32 = arith.constant 0 : i32
    %c0_i32_0 = arith.constant 0 : i32
    %c0_i32_1 = arith.constant 0 : i32
    return %c0_i32, %c0_i32_0 : i32, i32
  }
  func.func @transform_7(%arg0: i32) -> (i32, i32) {
    %c0_i32 = arith.constant 0 : i32
    %c0_i32_0 = arith.constant 0 : i32
    %c0_i32_1 = arith.constant 0 : i32
    return %c0_i32, %c0_i32_0 : i32, i32
  }
  func.func @transform_8(%arg0: i32) -> (i32, i32) {
    %c0_i32 = arith.constant 0 : i32
    %c0_i32_0 = arith.constant 0 : i32
    %c0_i32_1 = arith.constant 0 : i32
    return %c0_i32, %c0_i32_0 : i32, i32
  }
  func.func @transform_9(%arg0: i32) -> (i32, i32) {
    %c0_i32 = arith.constant 0 : i32
    %c0_i32_0 = arith.constant 0 : i32
    return %c0_i32, %arg0 : i32, i32
  }
}

</mosaic_0001>

<bundles_post_ra>
// kernel: tpu_custom_call.1
= control target key start
LH: loop header
LB: loop body
LE: loop exit
PB: predicated region body
PF: predicated region fallthrough
CT: control target
= control target key end

     0   :  { %vm61_vm0 = vcmask 1043456   ;;  %vm62_vm1 = vcmask 1044480   ;;  %vm54_vm2 = vcmask 72704   ;;  %v484_v3 = vmov 65535   ;;  %s590_s0 = inlined_call_operand.vmem [shape: f32[32,9], index: 0, kind: input, shape index: {}]   ;;  %s591_s1 = inlined_call_operand.vmem [shape: bf16[9,64], index: 1, kind: input, shape index: {}]   ;;  %s592_s2 = inlined_call_operand.vmem [shape: f32[1,64], index: 2, kind: input, shape index: {}]   ;;  %s593_s3 = inlined_call_operand.vmem [shape: bf16[64,32], index: 3, kind: input, shape index: {}]   ;;  %s594_s4 = inlined_call_operand.vmem [shape: f32[1,32], index: 4, kind: input, shape index: {}]   ;;  %s595_s5 = inlined_call_operand.vmem [shape: bf16[32,16], index: 5, kind: input, shape index: {}]   ;;  %s596_s6 = inlined_call_operand.vmem [shape: f32[1,16], index: 6, kind: input, shape index: {}]   ;;  %s597_s7 = inlined_call_operand.vmem [shape: bf16[2,16], index: 7, kind: input, shape index: {}]   ;;  %s598_s8 = inlined_call_operand.vmem [shape: f32[2,1], index: 8, kind: input, shape index: {}]   ;;  %s599_s9 = inlined_call_operand.hbm [shape: f32[2,32], index: 9, kind: output, shape index: {}]  }
   0x1   :  { %v455_v0 = vld [vmem:[%s591_s1] sm:$0x1f]   ;;  %v35_v2 = vld [vmem:[%s590_s0 + $0x8] sm:$0xff]  ;;  %v63_v4 = vsel %vm61_vm0, 4294967295, %v484_v3  ;;  %v36_v6 = vld [vmem:[%s590_s0 + $0x10] sm:$0xff] }
   0x2   :  { %v34_v1 = vld [vmem:[%s590_s0] sm:$0xff]  ;;  %v37_v7 = vld [vmem:[%s590_s0 + $0x18] sm:$0xff]  ;;  %v64_v8 = vsel %vm62_vm1, %v63_v4, 0 }
   0x3   :  { %v38_v5 = vpack.c.bf16 %v35_v2, %v34_v1  ;;  %v456_v9 = vld [vmem:[%s593_s3 + $0x18] sm:$0xff]   ;;  %v66_v10 = vand.u32 %v455_v0, %v64_v8  ;;  %v39_v11 = vpack.c.bf16 %v37_v7, %v36_v6 }
   0x5   :  { %417 = vmatprep.mubr.msk.bf16.mxu1 %vm54_vm2, %v38_v5  ;;  %415 = vmatprep.subr.bf16.mxu1 %v66_v10 }
   0x6   :  { %416 = vmatpush3.bf16.msra.mxu1 %v66_v10 }
   0x7   :  { %14 = vsyncpa [#allocation3], 0  ;;  %421 = vmatprep.subr.bf16.mxu1 %v456_v9  ;;  %v457_v12 = vld [vmem:[%s593_s3 + $0x10] sm:$0xff]   ;;  %v458_v13 = vld [vmem:[%s593_s3 + $0x8] sm:$0xff]   ;;  %vm162_vm3 = vcmask 523264   ;;  %vm247_vm4 = vcmask 261120  }
   0x8   :  { %v459_v14 = vld [vmem:[%s593_s3] sm:$0xff]   ;;  %v460_v30 = vld [vmem:[%s595_s5 + $0x8] sm:$0xff]   ;;  %v485_v47 = vmov 0.0   ;;  %vm486_vm5 = vmmov 0   ;;  %v487_v49 = vmov 0   ;;  %vm316_vm6 = vcmask 130048  }
   0x9   :  { %418 = vmatmul.mubr.msk.bf16.vlgmr.msra.gmra.mxu1 %vm54_vm2, %v39_v11  ;;  %v382_v17 = vld [vmem:[%s592_s2] ss:$0 sm:$0xff]  ;;  %433 = vmatprep.subr.bf16.mxu0 %v460_v30  ;;  %s488_s12 = smov [#allocation2]   ;;  %vm366_vm7 = vcmask 254976  }
   0xa   :  { %422 = vmatpush3.bf16.msra.mxu1 %v456_v9  ;;  %434 = vmatpush3.bf16.msra.mxu0 %v460_v30  ;;  %v461_v31 = vld [vmem:[%s595_s5] sm:$0xff]   ;;  %s374_s13 = sshll.u32 %s488_s12, 4  ;;  %s375_s13 = int_to_ptr.vmem [resolvable:$true] %s374_s13 }
   0xb   :  { %423 = vmatprep.subr.bf16.mxu1 %v457_v12  ;;  %435 = vmatprep.subr.bf16.mxu0 %v461_v31  ;;  %v386_v34 = vld [vmem:[%s594_s4] ss:$0 sm:$0xff]  ;;  %s462_s14 = scalar_lea.vmem %s375_s13, 32  ;;  %p467_p1 = scmp.lt.s32.totalorder %s375_s13, %s375_s13 }
   0xc   :  { %v310_v48 = vld [vmem:[%s598_s8] sm:$0x3]  ;;  %454 = vset.pattern.permute.xlu0 %v487_v49  ;;  %p463_p0 = scmp.ne.s32.totalorder %s375_s13, %s462_s14  ;;  %p468_p2 = scmp.lt.s32.totalorder %s462_s14, %s462_s14 }
   0xd   :  { %313 = vperm.xlu0 %454, %v310_v48   ;;  %v393_v51 = vld [vmem:[%s596_s6] ss:$0 sm:$0xff] }
   0xe   :  { %424 = vmatpush3.bf16.msra.mxu1 %v457_v12  ;;  %436 = vmatpush3.bf16.msra.mxu0 %v461_v31  ;;  %v307_v3 = vld [vmem:[%s597_s7] sm:$0x1]  ;;  %p469_p3 = por %p468_p2, %p467_p1 }
   0xf   :  { %425 = vmatprep.subr.bf16.mxu1 %v458_v13  ;;  %441 = vmatprep.subr.bf16.mxu0 %v485_v47 }
  0x10   :  { %p470_p4 = pnand %p469_p3, %p463_p0 }
  0x12   :  { %426 = vmatpush3.bf16.msra.mxu1 %v458_v13 }
  0x13   :  { %427 = vmatprep.subr.bf16.mxu1 %v459_v14 }
  0x16   :  { %428 = vmatpush3.bf16.msra.mxu1 %v459_v14 }
  0x88   :  { %v314_v4 = vpop.permute.xlu0 %313 }
  0xc9   :  { %v419_v15 = vpop.f32.mrf.mxu1 }
  0xca   :  { %v111_v21 = vadd.f32 %v419_v15, %v382_v17 }
  0xcb   :  { %v102_v16 = vpop.f32.mrf.mxu1 }
  0xcc   :  { %v103_v19 = vadd.f32 %v382_v17, %v102_v16  ;;  %v119_v27 = vmax.f32 %v111_v21, 0.0 }
  0xcd   :  { %v420_v18 = vpop.f32.mrf.mxu1 }
  0xce   :  { %v114_v20 = vadd.f32 %v420_v18, %v382_v17  ;;  %v117_v25 = vmax.f32 %v103_v19, 0.0 }
  0xcf   :  { %v105_v22 = vpop.f32.mrf.mxu1 }
  0xd0   :  { %v106_v23 = vadd.f32 %v382_v17, %v105_v22  ;;  %v120_v24 = vmax.f32 %v114_v20, 0.0 }
  0xd2   :  { %v118_v26 = vmax.f32 %v106_v23, 0.0  ;;  %v122_v29 = vpack.c.bf16 %v120_v24, %v119_v27 }
  0xd4   :  { %v121_v28 = vpack.c.bf16 %v118_v26, %v117_v25 }
  0xd6   :  { %429 = vmatprep.mubr.msk.bf16.mxu1 %vm162_vm3, %v121_v28 }
  0xd7   :  { %430 = vmatmul.mubr.msk.bf16.vlgmr.msra.gmra.mxu1 %vm162_vm3, %v122_v29 }
 0x197   :  { %v431_v32 = vpop.f32.mrf.mxu1 }
 0x198   :  { %v212_v38 = vadd.f32 %v431_v32, %v386_v34 }
 0x199   :  { %v203_v33 = vpop.f32.mrf.mxu1 }
 0x19a   :  { %v204_v36 = vadd.f32 %v386_v34, %v203_v33  ;;  %v220_v44 = vmax.f32 %v212_v38, 0.0 }
 0x19b   :  { %v432_v35 = vpop.f32.mrf.mxu1 }
 0x19c   :  { %v215_v37 = vadd.f32 %v432_v35, %v386_v34  ;;  %v218_v42 = vmax.f32 %v204_v36, 0.0 }
 0x19d   :  { %v206_v39 = vpop.f32.mrf.mxu1 }
 0x19e   :  { %v207_v40 = vadd.f32 %v386_v34, %v206_v39  ;;  %v221_v41 = vmax.f32 %v215_v37, 0.0 }
 0x1a0   :  { %v219_v43 = vmax.f32 %v207_v40, 0.0  ;;  %v223_v46 = vpack.c.bf16 %v221_v41, %v220_v44 }
 0x1a2   :  { %v222_v45 = vpack.c.bf16 %v219_v43, %v218_v42 }
 0x1a4   :  { %437 = vmatprep.mubr.msk.bf16.mxu0 %vm247_vm4, %v222_v45 }
 0x1a5   :  { %438 = vmatmul.mubr.msk.bf16.vlgmr.msra.gmra.mxu0 %vm247_vm4, %v223_v46 }
 0x1a6   :  { %445 = vmatprep.mubr.msk.bf16.mxu0 %vm486_vm5, %v485_v47 }
 0x265   :  { %v439_v50 = vpop.f32.mrf.mxu0 }
 0x266   :  { %v297_v53 = vadd.f32 %v439_v50, %v393_v51 }
 0x267   :  { %v288_v52 = vpop.f32.mrf.mxu0 }
 0x268   :  { %v305_v57 = vmax.f32 %v297_v53, 0.0  ;;  %v289_v60 = vadd.f32 %v393_v51, %v288_v52 }
 0x269   :  { %v440_v54 = vpop.f32.mrf.mxu0 }
 0x26a   :  { %v300_v55 = vadd.f32 %v440_v54, %v393_v51  ;;  %v303_v0 = vmax.f32 %v289_v60, 0.0 }
 0x26b   :  { %v291_v56 = vpop.f32.mrf.mxu0 }
 0x26c   :  { %v306_v58 = vmax.f32 %v300_v55, 0.0  ;;  %v292_v59 = vadd.f32 %v393_v51, %v291_v56 }
 0x26e   :  { %v309_v61 = vpack.c.bf16 %v306_v58, %v305_v57  ;;  %v304_v62 = vmax.f32 %v292_v59, 0.0 }
 0x270   :  { %v324_v63 = vsel %vm316_vm6, %v309_v61, 0  ;;  %v308_v1 = vpack.c.bf16 %v304_v62, %v303_v0 }
 0x271   :  { %442 = vmatpush3.bf16.xpose.msra.mxu0 %v324_v63 }
 0x272   :  { %443 = vmatprep.subr.bf16.mxu0 %v485_v47  ;;  %v321_v2 = vsel %vm316_vm6, %v308_v1, 0 }
 0x279   :  { %444 = vmatpush3.bf16.xpose.msra.mxu0 %v321_v2 }
 0x280   :  { %446 = vmatmul.mubr.msk.bf16.vlgmr.msra.gmra.mxu0 %vm316_vm6, %v307_v3 }
 0x340   :  { %v360_v5 = vpop.f32.mrf.mxu0 }
 0x341   :  { %v361_v6 = vadd.f32 %v360_v5, %v314_v4 }
 0x342   :  { %v447_v7 = vpop.f32.mrf.mxu0 }
 0x343   :  { %367 = vst.msk [vmem:[#allocation2] sm:$0x3] %vm366_vm7, %v361_v6 }
 0x344   :  { %v363_v8 = vpop.f32.mrf.mxu0 }
 0x345   :  { %473 = shalt.err (!%p470_p4)
}
 0x346   :  { %377 = dma.vmem_to_hbm [thread:$0]  %s375_s13, 32, %s599_s9, [#allocation3]   ;;  %v448_v9 = vpop.f32.mrf.mxu0 }
 0x347   :  { %482 = dma.done.wait [#allocation3], 32  }
 0x348   :  { %483 = vsyncadd [#allocation3], 4294967264 }
 0x349   :  { %381 = vsyncpa [#allocation3], 1 }

</bundles_post_ra>
